<compile_context>
chip_gen: v7x
topology: tpu7x:2x2x1
jax: 0.10.0
libtpu: 0.0.40
codegen_flags: <defaults>
</compile_context>

<pallas_src>
import functools

import jax
import jax.numpy as jnp
from jax.experimental import pallas as pl
from jax.experimental.pallas import tpu as pltpu

LANES = 128
MAX_BLOCK_ROWS = 8192   # (8192,128) f32 tile = 4 MiB / input / buffer


def _num_tensorcores() -> int:
    """v7x has 2 TensorCores per chip; v5e/v6e have 1."""
    try:
        kind = jax.devices()[0].device_kind.lower()
    except Exception:  # pragma: no cover - defensive
        return 1
    if "v7" in kind or "7x" in kind:
        return 2
    return 1


def _bce_sum_kernel(x_ref, t_ref, out_ref, acc_ref, *,
                    rows, block_rows, blocks_per_slice,
                    needs_mask, mask_from_blk):
    c = pl.program_id(0)   # parallel slice axis (per-TensorCore on v7x)
    i = pl.program_id(1)   # reduction axis within the slice

    @pl.when(i == 0)
    def _():
        acc_ref[...] = jnp.zeros_like(acc_ref)

    x = x_ref[...].astype(jnp.float32)
    t = t_ref[...].astype(jnp.float32)

    # sigmoid + BCE  ==  BCE-with-logits (numerically stable):
    #   loss = softplus(x) - t*x = max(x, 0) - t*x + log1p(exp(-|x|))
    loss = jnp.maximum(x, 0.0) - t * x + jnp.log1p(jnp.exp(-jnp.abs(x)))

    def _tree_add(vals):
        # (block_rows, 128) -> (block_rows//8, 8, 128) -> sum over vreg groups.
        return vals.reshape(block_rows // 8, 8, LANES).sum(axis=0)

    if needs_mask:
        blk = c * blocks_per_slice + i   # global block index (int32, no overflow)

        @pl.when(blk < mask_from_blk)
        def _():
            acc_ref[...] += _tree_add(loss)

        @pl.when(blk >= mask_from_blk)
        def _():
            # Only the tail / duplicated-clamped blocks pay for masking.
            row = jax.lax.broadcasted_iota(jnp.int32, loss.shape, 0)
            remaining_rows = rows - blk * block_rows   # <=0 => fully masked
            masked = jnp.where(row < remaining_rows, loss, 0.0)
            acc_ref[...] += _tree_add(masked)
    else:
        acc_ref[...] += _tree_add(loss)

    @pl.when(i == blocks_per_slice - 1)
    def _():
        out_ref[...] = acc_ref[...].reshape(1, 8, LANES)


def _stable_bce_sum(x, t):
    """Pure-JAX stable BCE-with-logits sum (tiny tails / fallback only)."""
    x = x.astype(jnp.float32)
    t = t.astype(jnp.float32)
    return jnp.sum(jnp.maximum(x, 0.0) - t * x + jnp.log1p(jnp.exp(-jnp.abs(x))))


def bce_loss(inputs, targets, smooth=1):
    """Pallas implementation of BCELoss.forward (returns a scalar f32)."""
    del smooth  # unused by the PyTorch module's BCE path
    n = int(inputs.size)

    x = inputs.reshape(-1)
    t = targets.reshape(-1)

    rows = n // LANES
    kernel_elems = rows * LANES

    if rows < 8:
        # Sub-vreg-sized input: not worth a kernel launch.
        return _stable_bce_sum(x, t) / jnp.float32(n)

    if kernel_elems != n:
        # TODO(synk): the prefix slice may still materialize one copy for
        # ragged numel; it replaces the previous full jnp.pad of both inputs
        # and keeps the <128-element tail out of the kernel.
        xk = jax.lax.slice(x, (0,), (kernel_elems,))
        tk = jax.lax.slice(t, (0,), (kernel_elems,))
    else:
        xk, tk = x, t

    x2 = xk.reshape(rows, LANES)   # lane-dense, free reshape (contiguous)
    t2 = tk.reshape(rows, LANES)

    # Block rows: largest multiple of 8 that fits, capped by MAX_BLOCK_ROWS.
    block_rows = min(MAX_BLOCK_ROWS, (rows // 8) * 8)
    assert block_rows % 8 == 0 and block_rows >= 8

    total_blocks = (rows + block_rows - 1) // block_rows
    num_slices = min(_num_tensorcores(), total_blocks)
    blocks_per_slice = (total_blocks + num_slices - 1) // num_slices
    covered_blocks = num_slices * blocks_per_slice
    assert covered_blocks * block_rows >= rows

    # Masking is needed only if the last real block overhangs the row count or
    # the clamped index_map produces duplicated tail blocks.
    ragged_rows = (rows % block_rows) != 0
    needs_mask = ragged_rows or (covered_blocks != total_blocks)
    mask_from_blk = (total_blocks - 1) if ragged_rows else total_blocks

    def in_map(c, i):
        blk = c * blocks_per_slice + i
        # Clamp so duplicated tail blocks stay in bounds (fully masked in-kernel).
        return (jnp.minimum(blk, total_blocks - 1), 0)

    kernel = functools.partial(
        _bce_sum_kernel,
        rows=rows,
        block_rows=block_rows,
        blocks_per_slice=blocks_per_slice,
        needs_mask=needs_mask,
        mask_from_blk=mask_from_blk,
    )

    in_bytes_per_step = block_rows * LANES * (
        jnp.dtype(x2.dtype).itemsize + jnp.dtype(t2.dtype).itemsize)
    vmem_limit = int(min(2 * in_bytes_per_step + (4 << 20), 40 << 20))

    partials = pl.pallas_call(
        kernel,
        out_shape=jax.ShapeDtypeStruct((num_slices, 8, LANES), jnp.float32),
        grid_spec=pltpu.PrefetchScalarGridSpec(
            num_scalar_prefetch=0,
            grid=(num_slices, blocks_per_slice),
            in_specs=[
                pl.BlockSpec((block_rows, LANES), in_map),
                pl.BlockSpec((block_rows, LANES), in_map),
            ],
            out_specs=pl.BlockSpec((1, 8, LANES), lambda c, i: (c, 0, 0)),
            scratch_shapes=[pltpu.VMEM((8, LANES), jnp.float32)],
        ),
        compiler_params=pltpu.CompilerParams(
            dimension_semantics=("parallel", "arbitrary"),
            vmem_limit_bytes=vmem_limit,
        ),
    )(x2, t2)

    total = jnp.sum(partials)
    if kernel_elems != n:
        total = total + _stable_bce_sum(x[kernel_elems:], t[kernel_elems:])

    return total / jnp.float32(n)


def _bce_loss_ref(inputs, targets, smooth=1):
    """Pure-JAX reference matching the PyTorch module: sigmoid + BCE mean."""
    del smooth
    p = jax.nn.sigmoid(inputs.reshape(-1).astype(jnp.float32))
    t = targets.reshape(-1).astype(jnp.float32)
    bce = -(t * jnp.log(p) + (1.0 - t) * jnp.log(1.0 - p))
    return jnp.mean(bce)


if __name__ == "__main__":
    key = jax.random.PRNGKey(0)
    k_in, k_tg = jax.random.split(key)

    # NCHW logits and binary mask targets, as the segmentation loss expects.
    inputs = jax.random.normal(k_in, (2, 4, 16, 16), dtype=jnp.float32)
    targets = (jax.random.uniform(k_tg, (2, 4, 16, 16)) > 0.5).astype(jnp.float32)

    loss = jax.block_until_ready(bce_loss(inputs, targets, smooth=1))
    ref = jax.block_until_ready(_bce_loss_ref(inputs, targets, smooth=1))

    assert jnp.allclose(loss, ref, atol=1e-5, rtol=1e-5), (loss, ref)
    print("KERNEL_OK")
</pallas_src>

<mosaic_0001>
module attributes {stable_mosaic.version = 11 : i64} {
  func.func @_bce_sum_kernel(%arg0: i32, %arg1: i32, %arg2: memref<16x128xf32, #tpu.memory_space<vmem>>, %arg3: memref<16x128xf32, #tpu.memory_space<vmem>>, %arg4: memref<1x8x128xf32, #tpu.memory_space<vmem>>, %arg5: memref<8x128xf32, #tpu.memory_space<vmem>>) attributes {dimension_semantics = [#tpu.dimension_semantics<parallel>, #tpu.dimension_semantics<arbitrary>], iteration_bounds = array<i64: 1, 1>, scalar_prefetch = 0 : i64, scratch_operands = 1 : i64, tpu.core_type = #tpu.core_type<tc>, window_params = [{transform_indices = @transform_0, window_bounds = array<i64: 16, 128>}, {transform_indices = @transform_1, window_bounds = array<i64: 16, 128>}, {transform_indices = @transform_2, window_bounds = array<i64: 1, 8, 128>}]} {
    %c0_i32 = arith.constant 0 : i32
    %0 = arith.cmpi eq, %arg1, %c0_i32 : i32
    %1 = arith.extui %0 : i1 to i32
    %c0_i32_0 = arith.constant 0 : i32
    %2 = arith.cmpi ne, %1, %c0_i32_0 : i32
    scf.if %2 {
      %cst_12 = arith.constant 0.000000e+00 : f32
      %23 = vector.broadcast %cst_12 : f32 to vector<8x128xf32>
      %c0_13 = arith.constant 0 : index
      %c0_14 = arith.constant 0 : index
      %24 = vector.load %arg5[%c0_13, %c0_14] : memref<8x128xf32, #tpu.memory_space<vmem>>, vector<8x128xf32>
      tpu.vector_store %arg5[%c0_13, %c0_14], %23 {strides = array<i32>} : memref<8x128xf32, #tpu.memory_space<vmem>>, vector<8x128xf32>,
    } else {
    }
    %c0 = arith.constant 0 : index
    %c0_1 = arith.constant 0 : index
    %3 = vector.load %arg2[%c0, %c0_1] : memref<16x128xf32, #tpu.memory_space<vmem>>, vector<16x128xf32>
    %c0_2 = arith.constant 0 : index
    %c0_3 = arith.constant 0 : index
    %4 = vector.load %arg3[%c0_2, %c0_3] : memref<16x128xf32, #tpu.memory_space<vmem>>, vector<16x128xf32>
    %cst = arith.constant 0.000000e+00 : f32
    %5 = vector.broadcast %cst : f32 to vector<16x128xf32>
    %6 = arith.maximumf %3, %5 : vector<16x128xf32>
    %7 = arith.mulf %4, %3 : vector<16x128xf32>
    %8 = arith.subf %6, %7 : vector<16x128xf32>
    %9 = math.absf %3 : vector<16x128xf32>
    %cst_4 = arith.constant 0.000000e+00 : f32
    %10 = vector.broadcast %cst_4 : f32 to vector<16x128xf32>
    %11 = arith.subf %10, %9 : vector<16x128xf32>
    %12 = math.exp %11 : vector<16x128xf32>
    %13 = math.log1p %12 : vector<16x128xf32>
    %14 = arith.addf %8, %13 : vector<16x128xf32>
    %c0_5 = arith.constant 0 : index
    %c0_6 = arith.constant 0 : index
    %15 = vector.load %arg5[%c0_5, %c0_6] : memref<8x128xf32, #tpu.memory_space<vmem>>, vector<8x128xf32>
    %16 = vector.shape_cast %14 : vector<16x128xf32> to vector<2x8x128xf32>
    %cst_7 = arith.constant dense<0.000000e+00> : vector<8x128xf32>
    %17 = vector.multi_reduction <add>, %16, %cst_7 [0] : vector<2x8x128xf32> to vector<8x128xf32>
    %18 = arith.addf %15, %17 : vector<8x128xf32>
    %c0_8 = arith.constant 0 : index
    %c0_9 = arith.constant 0 : index
    %19 = vector.load %arg5[%c0_8, %c0_9] : memref<8x128xf32, #tpu.memory_space<vmem>>, vector<8x128xf32>
    tpu.vector_store %arg5[%c0_8, %c0_9], %18 {strides = array<i32>} : memref<8x128xf32, #tpu.memory_space<vmem>>, vector<8x128xf32>,
    %c0_i32_10 = arith.constant 0 : i32
    %20 = arith.cmpi eq, %arg1, %c0_i32_10 : i32
    %21 = arith.extui %20 : i1 to i32
    %c0_i32_11 = arith.constant 0 : i32
    %22 = arith.cmpi ne, %21, %c0_i32_11 : i32
    scf.if %22 {
      %c0_12 = arith.constant 0 : index
      %c0_13 = arith.constant 0 : index
      %23 = vector.load %arg5[%c0_12, %c0_13] : memref<8x128xf32, #tpu.memory_space<vmem>>, vector<8x128xf32>
      %24 = vector.shape_cast %23 : vector<8x128xf32> to vector<1x8x128xf32>
      %c0_14 = arith.constant 0 : index
      %c0_15 = arith.constant 0 : index
      %c0_16 = arith.constant 0 : index
      %25 = vector.load %arg4[%c0_14, %c0_15, %c0_16] : memref<1x8x128xf32, #tpu.memory_space<vmem>>, vector<1x8x128xf32>
      tpu.vector_store %arg4[%c0_14, %c0_15, %c0_16], %24 {strides = array<i32>} : memref<1x8x128xf32, #tpu.memory_space<vmem>>, vector<1x8x128xf32>,
    } else {
    }
    return
  }
  func.func @transform_0(%arg0: i32, %arg1: i32) -> (i32, i32) {
    %c1_i32 = arith.constant 1 : i32
    %0 = arith.muli %arg0, %c1_i32 : i32
    %1 = arith.addi %0, %arg1 : i32
    %c0_i32 = arith.constant 0 : i32
    %2 = arith.minsi %1, %c0_i32 : i32
    %c0_i32_0 = arith.constant 0 : i32
    %c0_i32_1 = arith.constant 0 : i32
    return %2, %c0_i32_0 : i32, i32
  }
  func.func @transform_1(%arg0: i32, %arg1: i32) -> (i32, i32) {
    %c1_i32 = arith.constant 1 : i32
    %0 = arith.muli %arg0, %c1_i32 : i32
    %1 = arith.addi %0, %arg1 : i32
    %c0_i32 = arith.constant 0 : i32
    %2 = arith.minsi %1, %c0_i32 : i32
    %c0_i32_0 = arith.constant 0 : i32
    %c0_i32_1 = arith.constant 0 : i32
    return %2, %c0_i32_0 : i32, i32
  }
  func.func @transform_2(%arg0: i32, %arg1: i32) -> (i32, i32, i32) {
    %c0_i32 = arith.constant 0 : i32
    %c0_i32_0 = arith.constant 0 : i32
    %c0_i32_1 = arith.constant 0 : i32
    return %arg0, %c0_i32, %c0_i32_0 : i32, i32, i32
  }
}

</mosaic_0001>

<bundles_post_ra>
// kernel: tpu_custom_call.1
= control target key start
LH: loop header
LB: loop body
LE: loop exit
PB: predicated region body
PF: predicated region fallthrough
CT: control target
= control target key end

     0   :  { %7 = vsyncpa [#allocation4], 0  ;;  %s273_s0 = inlined_call_operand.hbm [shape: f32[16,128], index: 0, kind: input, shape index: {}]   ;;  %s274_s1 = inlined_call_operand.hbm [shape: f32[16,128], index: 1, kind: input, shape index: {}]   ;;  %s275_s2 = inlined_call_operand.hbm [shape: f32[1,8,128], index: 2, kind: output, shape index: {}]  }
   0x1   :  { %8 = vsyncpa [#allocation7], 0 }
   0x2   :  { %9 = vsyncpa [#allocation5], 0  ;;  %s217_s9 = smov [#allocation3]   ;;  %s145_s13 = scalar_lea.hbm %s273_s0, 256 }
   0x3   :  { %s21_s10 = sshll.u32 %s217_s9, 4  ;;  %p146_p0 = scmp.ne.s32.totalorder %s273_s0, %s145_s13  ;;  %s22_s10 = int_to_ptr.vmem [resolvable:$true] %s21_s10 }
   0x4   :  { %p149_p1 = scmp.lt.u32.totalorder %s145_s13, %s273_s0 }
   0x6   :  { %p151_p2 = pnand %p149_p1, %p146_p0 }
   0x8   :  { %154 = shalt.err (!%p151_p2)
}
   0x9   :  { %s155_s18 = scalar_lea.vmem %s22_s10, 256  ;;  %p160_p4 = scmp.lt.s32.totalorder %s22_s10, %s22_s10 }
   0xa   :  { %p156_p3 = scmp.ne.s32.totalorder %s22_s10, %s155_s18  ;;  %p161_p5 = scmp.lt.s32.totalorder %s155_s18, %s155_s18 }
   0xc   :  { %p162_p6 = por %p161_p5, %p160_p4 }
   0xe   :  { %p163_p7 = pnand %p162_p6, %p156_p3 }
  0x10   :  { %166 = shalt.err (!%p163_p7)
}
  0x11   :  { %s218_s19 = smov 128   ;;  %s219_s20 = smov 8  }
  0x12   :  { %27 = dma.hbm_to_vmem [thread:$0]  %s273_s0, 256, %s22_s10, [#allocation4], %s218_s19, %s218_s19, %s219_s20  }
  0x13   :  { %s220_s23 = smov [#allocation6]   ;;  %s167_s27 = scalar_lea.hbm %s274_s1, 256 }
  0x14   :  { %s39_s24 = sshll.u32 %s220_s23, 4  ;;  %p168_p8 = scmp.ne.s32.totalorder %s274_s1, %s167_s27  ;;  %s40_s24 = int_to_ptr.vmem [resolvable:$true] %s39_s24 }
  0x15   :  { %p171_p9 = scmp.lt.u32.totalorder %s167_s27, %s274_s1 }
  0x17   :  { %p173_p10 = pnand %p171_p9, %p168_p8 }
  0x19   :  { %176 = shalt.err (!%p173_p10)
}
  0x1a   :  { %s177_s4 = scalar_lea.vmem %s40_s24, 256  ;;  %p182_p12 = scmp.lt.s32.totalorder %s40_s24, %s40_s24 }
  0x1b   :  { %p178_p11 = scmp.ne.s32.totalorder %s40_s24, %s177_s4  ;;  %p183_p13 = scmp.lt.s32.totalorder %s177_s4, %s177_s4 }
  0x1d   :  { %p184_p0 = por %p183_p13, %p182_p12 }
  0x1f   :  { %p185_p1 = pnand %p184_p0, %p178_p11 }
  0x21   :  { %188 = shalt.err (!%p185_p1)
}
  0x22   :  { %45 = dma.hbm_to_vmem [thread:$0]  %s274_s1, 256, %s40_s24, [#allocation7], %s218_s19, %s218_s19, %s219_s20  }
  0x23   :  { %211 = dma.done.wait [#allocation4], 256  }
  0x24   :  { %212 = vsyncadd [#allocation4], 4294967040 }
  0x25   :  { %213 = dma.done.wait [#allocation7], 256  }
  0x26   :  { %214 = vsyncadd [#allocation7], 4294967040  ;;  %v65_v0 = vld [vmem:[#allocation3] sm:$0xff]  ;;  %v66_v1 = vld [vmem:[#allocation3 + $0x8] sm:$0xff]  ;;  %s221_s1 = smov [#allocation8]  }
  0x27   :  { %v75_v2 = vand.u32 2147483647, %v65_v0  ;;  %v76_v3 = vand.u32 2147483647, %v66_v1  ;;  %v67_v14 = vld [vmem:[#allocation6] sm:$0xff]  ;;  %v68_v15 = vld [vmem:[#allocation6 + $0x8] sm:$0xff] }
  0x28   :  { %v69_v17 = vmax.f32 %v65_v0, 0.0  ;;  %v71_v18 = vmul.f32 %v67_v14, %v65_v0  ;;  %v70_v21 = vmax.f32 %v66_v1, 0.0  ;;  %v72_v22 = vmul.f32 %v68_v15, %v66_v1  ;;  %s118_s6 = sshll.u32 %s221_s1, 4  ;;  %s119_s6 = int_to_ptr.vmem [resolvable:$true] %s118_s6 }
  0x29   :  { %v77_v4 = vsub.f32 0.0, %v75_v2  ;;  %v78_v5 = vsub.f32 0.0, %v76_v3  ;;  %s189_s7 = scalar_lea.vmem %s119_s6, 128  ;;  %p194_p3 = scmp.lt.s32.totalorder %s119_s6, %s119_s6 }
  0x2a   :  { %v73_v26 = vsub.f32 %v69_v17, %v71_v18  ;;  %v74_v29 = vsub.f32 %v70_v21, %v72_v22  ;;  %p190_p2 = scmp.ne.s32.totalorder %s119_s6, %s189_s7  ;;  %p195_p4 = scmp.lt.s32.totalorder %s189_s7, %s189_s7 }
  0x2b   :  { %v79_v6 = vmul.f32 1.442695, %v77_v4  ;;  %v81_v7 = vmul.f32 1.442695, %v78_v5 }
  0x2c   :  { %p196_p5 = por %p195_p4, %p194_p3 }
  0x2d   :  { %137 = vpow2.f32 %v79_v6 }
  0x2e   :  { %139 = vpow2.f32 %v81_v7  ;;  %p197_p6 = pnand %p196_p5, %p190_p2 }
  0x37   :  { %v138_v8 = vpop.eup %137 }
  0x38   :  { %v140_v9 = vpop.eup %139  ;;  %v83_v10 = vadd.f32 1.0, %v138_v8  ;;  %v86_v12 = vmul.f32 -0.5, %v138_v8  ;;  %v89_v19 = vand.u32 2147483647, %v138_v8 }
  0x39   :  { %v92_v11 = vadd.f32 1.0, %v140_v9  ;;  %v95_v13 = vmul.f32 -0.5, %v140_v9  ;;  %v98_v23 = vand.u32 2147483647, %v140_v9 }
  0x3a   :  { %141 = vlog2.f32 %v83_v10  ;;  %v87_v16 = vadd.f32 1.0, %v86_v12  ;;  %vm90_vm0 = vcmp.lt.f32.partialorder %v89_v19, 0.0004427343 }
  0x3b   :  { %143 = vlog2.f32 %v92_v11  ;;  %v96_v20 = vadd.f32 1.0, %v95_v13  ;;  %vm99_vm1 = vcmp.lt.f32.partialorder %v98_v23, 0.0004427343 }
  0x3c   :  { %v88_v24 = vmul.f32 %v138_v8, %v87_v16 }
  0x3d   :  { %v97_v27 = vmul.f32 %v140_v9, %v96_v20 }
  0x44   :  { %v142_v25 = vpop.eup %141 }
  0x45   :  { %v144_v28 = vpop.eup %143  ;;  %v85_v30 = vmul.f32 0.6931472, %v142_v25 }
  0x46   :  { %v94_v31 = vmul.f32 0.6931472, %v144_v28 }
  0x47   :  { %v91_v32 = vsel %vm90_vm0, %v88_v24, %v85_v30 }
  0x48   :  { %v100_v33 = vsel %vm99_vm1, %v97_v27, %v94_v31  ;;  %v101_v34 = vadd.f32 %v91_v32, %v73_v26 }
  0x49   :  { %v102_v35 = vadd.f32 %v100_v33, %v74_v29 }
  0x4b   :  { %v104_v36 = vadd.f32 %v102_v35, %v101_v34 }
  0x4d   :  { %111 = vst [vmem:[#allocation8] sm:$0xff] %v104_v36 }
  0x4e   :  { %200 = shalt.err (!%p197_p6)
}
  0x4f   :  { %s201_s10 = scalar_lea.hbm %s275_s2, 128 }
  0x50   :  { %p202_p7 = scmp.ne.s32.totalorder %s275_s2, %s201_s10  ;;  %p205_p8 = scmp.lt.u32.totalorder %s201_s10, %s275_s2 }
  0x52   :  { %p207_p9 = pnand %p205_p8, %p202_p7 }
  0x54   :  { %210 = shalt.err (!%p207_p9)
}
  0x55   :  { %121 = dma.vmem_to_hbm [thread:$0]  %s119_s6, 128, %s275_s2, [#allocation5]  }
  0x56   :  { %215 = dma.done.wait [#allocation5], 128  }
  0x57   :  { %216 = vsyncadd [#allocation5], 4294967168 }
  0x58   :  { %125 = vsyncpa [#allocation4], 1 }
  0x59   :  { %126 = vsyncpa [#allocation7], 1 }
  0x5a   :  { %127 = vsyncpa [#allocation5], 1 }

</bundles_post_ra>
